<compile_context>
chip_gen: v7x
topology: tpu7x:2x2x1
jax: 0.10.0
libtpu: 0.0.40
codegen_flags: <defaults>
</compile_context>

<pallas_src>
import jax
import jax.numpy as jnp
from jax.experimental import pallas as pl
from jax.experimental.pallas import tpu as pltpu


# ----------------------------------------------------------------------------
# helpers
# ----------------------------------------------------------------------------
def _round_up(x, m):
    return ((x + m - 1) // m) * m


def _tile(dim, max_tile, align):
    """Pick a tile size (multiple of `align`, <= max_tile) and padded extent."""
    steps = -(-dim // max_tile)                     # ceil-div
    tile = _round_up(-(-dim // steps), align)
    return tile, tile * steps


# ----------------------------------------------------------------------------
# Pallas kernel: tiled im2col matmul + fused BN bias init + ReLU epilogue
# ----------------------------------------------------------------------------
def _matmul_bias_relu_kernel(x_ref, w_ref, b_ref, o_ref, acc_ref):
    k = pl.program_id(3)

    @pl.when(k == 0)
    def _init():
        # accumulator starts at the (fused BN) bias -> no epilogue add
        acc_ref[...] = jnp.broadcast_to(b_ref[...].astype(jnp.float32),
                                        acc_ref.shape)

    acc_ref[...] += jnp.dot(x_ref[0], w_ref[...],
                            preferred_element_type=jnp.float32)

    @pl.when(k == pl.num_programs(3) - 1)
    def _store():
        o_ref[0] = jnp.maximum(acc_ref[...], 0.0).astype(o_ref.dtype)


def conv3x3_bn_relu(x, w, scale, bias, *, tm_max=512, tk_max=2048, tc_max=256):
    """Fused 3x3 conv (zero pad 1) + BatchNorm(eval, folded) + ReLU.

    x: (N,H,W,Cin) float, w: (3,3,Cin,Cout) f32, scale/bias: (Cout,) fused BN.
    Returns (N,H,W,Cout) bfloat16 (bf16 MXU operands, f32 accumulation).
    """
    N, H, W, Cin = x.shape
    Cout = w.shape[-1]
    M, K = H * W, 9 * Cin

    # Fold BN scale into the weights; bf16 operands for the MXU.
    wmat = (w * scale).reshape(K, Cout).astype(jnp.bfloat16)
    brow = bias.reshape(1, Cout).astype(jnp.float32)

    # im2col in the wrapper (tap = dy*3 + dx, channel-minor) — matches the
    # (dy, dx, cin) flattening of wmat; removes in-kernel W-shifted copies.
    xp = jnp.pad(x.astype(jnp.bfloat16), ((0, 0), (1, 1), (1, 1), (0, 0)))
    cols = [xp[:, dy:dy + H, dx:dx + W, :]
            for dy in range(3) for dx in range(3)]
    xcol = jnp.concatenate(cols, axis=-1).reshape(N, M, K)

    TM, Mp = _tile(M, tm_max, 8)        # spatial rows tile   (sublane-aligned)
    TK, Kp = _tile(K, tk_max, 128)      # contraction tile    (lane-aligned)
    TC, Cp = _tile(Cout, tc_max, 128)   # output-channel tile (lane-dense)

    xcol = jnp.pad(xcol, ((0, 0), (0, Mp - M), (0, Kp - K)))
    wmat = jnp.pad(wmat, ((0, Kp - K), (0, Cp - Cout)))
    brow = jnp.pad(brow, ((0, 0), (0, Cp - Cout)))

    out = pl.pallas_call(
        _matmul_bias_relu_kernel,
        out_shape=jax.ShapeDtypeStruct((N, Mp, Cp), jnp.bfloat16),
        grid=(N, Mp // TM, Cp // TC, Kp // TK),
        in_specs=[
            pl.BlockSpec((1, TM, TK), lambda n, m, c, k: (n, m, k)),
            pl.BlockSpec((TK, TC), lambda n, m, c, k: (k, c)),
            pl.BlockSpec((1, TC), lambda n, m, c, k: (0, c)),
        ],
        out_specs=pl.BlockSpec((1, TM, TC), lambda n, m, c, k: (n, m, c)),
        scratch_shapes=[pltpu.VMEM((TM, TC), jnp.float32)],
        compiler_params=pltpu.CompilerParams(
            dimension_semantics=("parallel", "parallel", "parallel",
                                 "arbitrary"),
            vmem_limit_bytes=64 * 1024 * 1024),
    )(xcol, wmat, brow)

    return out[:, :M, :Cout].reshape(N, H, W, Cout)


# ----------------------------------------------------------------------------
# Plain-JAX glue (memory-bound reshuffles / tiny ops kept out of Pallas)
# ----------------------------------------------------------------------------
def conv1x1(x, w, b):
    """OutConv (Cout=2): plain JAX — a 2-lane Pallas output would force masked
    partial stores and a ~1%-utilised MXU matmul."""
    y = jnp.einsum("nhwc,cd->nhwd", x.astype(jnp.float32), w,
                   preferred_element_type=jnp.float32)
    return y + b[None, None, None, :]


def maxpool2x2(x):
    N, H, W, C = x.shape
    return x.reshape(N, H // 2, 2, W // 2, 2, C).max(axis=(2, 4))


def _interp_matrix(n_in, n_out):
    """Dense 1-D interpolation matrix for align_corners=True bilinear 2x."""
    if n_in == 1:
        return jnp.ones((n_out, 1), jnp.float32)
    src = jnp.arange(n_out, dtype=jnp.float32) * (n_in - 1) / (n_out - 1)
    i0 = jnp.clip(jnp.floor(src).astype(jnp.int32), 0, n_in - 1)
    i1 = jnp.minimum(i0 + 1, n_in - 1)
    f = src - i0.astype(jnp.float32)
    return (jax.nn.one_hot(i0, n_in, dtype=jnp.float32) * (1.0 - f)[:, None]
            + jax.nn.one_hot(i1, n_in, dtype=jnp.float32) * f[:, None])


def upsample_bilinear_x2(x):
    """F.interpolate(scale_factor=2, mode='bilinear', align_corners=True)
    as two small dense matmuls (no gathers)."""
    N, H, W, C = x.shape
    ah = _interp_matrix(H, 2 * H)
    aw = _interp_matrix(W, 2 * W)
    y = jnp.einsum("oh,nhwc->nowc", ah, x.astype(jnp.float32))
    y = jnp.einsum("pw,nowc->nopc", aw, y)
    return y.astype(x.dtype)


def rot_mac(a):
    """MAC-grid curl of vector potential a (NHWC, 1 channel) -> (NHWC, 2 ch)."""
    dy = jnp.pad(a[:, 1:, :, :], ((0, 0), (0, 1), (0, 0), (0, 0))) - a
    dx = jnp.pad(a[:, :, 1:, :], ((0, 0), (0, 0), (0, 1), (0, 0))) - a
    return jnp.concatenate([dy, -dx], axis=-1)


# ----------------------------------------------------------------------------
# Parameters (deterministic synthetic init, PyTorch shapes)
# ----------------------------------------------------------------------------
def init_params(key, hidden_size=64):
    hs = hidden_size
    specs = {
        "inc":   [(13, hs), (hs, hs)],
        "down1": [(hs, 2 * hs), (2 * hs, 2 * hs)],
        "down2": [(2 * hs, 4 * hs), (4 * hs, 4 * hs)],
        "down3": [(4 * hs, 8 * hs), (8 * hs, 8 * hs)],
        "down4": [(8 * hs, 8 * hs), (8 * hs, 8 * hs)],      # 16*hs // 2
        "up1":   [(16 * hs, 8 * hs), (8 * hs, 4 * hs)],     # mid = in // 2
        "up2":   [(8 * hs, 4 * hs), (4 * hs, 2 * hs)],
        "up3":   [(4 * hs, 2 * hs), (2 * hs, hs)],
        "up4":   [(2 * hs, hs), (hs, hs)],
    }
    eps = 1e-5
    bn_scale_unit = 1.0 / jnp.sqrt(1.0 + eps)      # gamma=1, running var=1
    params = {}
    for name, convs in specs.items():
        layer = []
        for cin, cout in convs:
            key, k1, k2 = jax.random.split(key, 3)
            w = jax.random.normal(k1, (3, 3, cin, cout), jnp.float32) / jnp.sqrt(9.0 * cin)
            b = 0.01 * jax.random.normal(k2, (cout,), jnp.float32)
            scale = jnp.full((cout,), bn_scale_unit, jnp.float32)
            bias = b * scale                        # beta=0, running mean=0
            layer.append({"w": w, "scale": scale, "bias": bias})
        params[name] = layer
    key, k1, k2 = jax.random.split(key, 3)
    params["outc"] = {
        "w": jax.random.normal(k1, (hs, 2), jnp.float32) / jnp.sqrt(float(hs)),
        "b": 0.01 * jax.random.normal(k2, (2,), jnp.float32),
    }
    return params


# ----------------------------------------------------------------------------
# Forward pass (mirrors PDE_UNet2.forward, forcing=False, bilinear=True)
# ----------------------------------------------------------------------------
def _double_conv(x, layer):
    x = conv3x3_bn_relu(x, layer[0]["w"], layer[0]["scale"], layer[0]["bias"])
    x = conv3x3_bn_relu(x, layer[1]["w"], layer[1]["scale"], layer[1]["bias"])
    return x


def _down(x, layer):
    return _double_conv(maxpool2x2(x), layer)


def _up(x1, x2, layer):
    x1 = upsample_bilinear_x2(x1)
    # F.pad inside Up is a no-op here: spatial dims are multiples of 16.
    return _double_conv(jnp.concatenate([x2, x1], axis=-1), layer)


def pde_unet2_forward(params, a_old, p_old, mask_flow, v_cond, mask_cond):
    """Inputs / outputs are NCHW float32, matching the PyTorch module."""
    to_nhwc = lambda t: jnp.transpose(t, (0, 2, 3, 1))
    a = to_nhwc(a_old)
    p = to_nhwc(p_old)
    mf = to_nhwc(mask_flow)
    vc = to_nhwc(v_cond)
    mc = to_nhwc(mask_cond)

    v_old = rot_mac(a)
    x = jnp.concatenate(
        [p, a, v_old, mf, vc * mc, mc, mf * p, mf * v_old, v_old * mc], axis=-1
    )  # 13 channels

    x1 = _double_conv(x, params["inc"])
    x2 = _down(x1, params["down1"])
    x3 = _down(x2, params["down2"])
    x4 = _down(x3, params["down3"])
    x5 = _down(x4, params["down4"])
    x = _up(x5, x4, params["up1"])
    x = _up(x, x3, params["up2"])
    x = _up(x, x2, params["up3"])
    x = _up(x, x1, params["up4"])
    x = conv1x1(x, params["outc"]["w"], params["outc"]["b"])

    a_new = 400.0 * jnp.tanh((a + x[..., 0:1]) / 400.0)
    p_new = 10.0 * jnp.tanh((p + x[..., 1:2]) / 10.0)

    from_nhwc = lambda t: jnp.transpose(t, (0, 3, 1, 2))
    return from_nhwc(a_new), from_nhwc(p_new)


# ----------------------------------------------------------------------------
if __name__ == "__main__":
    HIDDEN = 32
    N, H, W = 2, 16, 16

    key = jax.random.PRNGKey(0)
    key, kp = jax.random.split(key)
    params = init_params(kp, hidden_size=HIDDEN)

    key, k1, k2, k3, k4, k5 = jax.random.split(key, 6)
    a_old = jax.random.normal(k1, (N, 1, H, W), jnp.float32)
    p_old = jax.random.normal(k2, (N, 1, H, W), jnp.float32)
    mask_flow = (jax.random.uniform(k3, (N, 1, H, W)) > 0.5).astype(jnp.float32)
    v_cond = jax.random.normal(k4, (N, 2, H, W), jnp.float32)
    mask_cond = (jax.random.uniform(k5, (N, 1, H, W)) > 0.5).astype(jnp.float32)

    # --- self-check: Pallas conv vs XLA conv (bf16 operands, f32 accumulate) ---
    lyr = params["inc"][0]
    xt = jax.random.normal(key, (N, H, W, 13), jnp.float32)
    got = conv3x3_bn_relu(xt, lyr["w"], lyr["scale"], lyr["bias"]).astype(jnp.float32)
    ref = jax.lax.conv_general_dilated(
        xt.astype(jnp.bfloat16), (lyr["w"] * lyr["scale"]).astype(jnp.bfloat16),
        window_strides=(1, 1), padding="SAME",
        dimension_numbers=("NHWC", "HWIO", "NHWC"),
        preferred_element_type=jnp.float32) + lyr["bias"]
    ref = jnp.maximum(ref, 0.0)
    assert bool(jnp.all(jnp.abs(got - ref) <= 0.05 + 0.05 * jnp.abs(ref)))

    fwd = jax.jit(pde_unet2_forward)
    a_new, p_new = fwd(params, a_old, p_old, mask_flow, v_cond, mask_cond)
    jax.block_until_ready((a_new, p_new))

    assert a_new.shape == (N, 1, H, W) and p_new.shape == (N, 1, H, W)
    assert bool(jnp.all(jnp.isfinite(a_new))) and bool(jnp.all(jnp.isfinite(p_new)))
    print("KERNEL_OK")
</pallas_src>

<mosaic_0001>
module attributes {stable_mosaic.version = 11 : i64} {
  func.func @_matmul_bias_relu_kernel(%arg0: i32, %arg1: i32, %arg2: i32, %arg3: i32, %arg4: memref<1x256x128xbf16, #tpu.memory_space<vmem>>, %arg5: memref<128x128xbf16, #tpu.memory_space<vmem>>, %arg6: memref<1x128xf32, #tpu.memory_space<vmem>>, %arg7: memref<1x256x128xbf16, #tpu.memory_space<vmem>>, %arg8: memref<256x128xf32, #tpu.memory_space<vmem>>) attributes {dimension_semantics = [#tpu.dimension_semantics<parallel>, #tpu.dimension_semantics<parallel>, #tpu.dimension_semantics<parallel>, #tpu.dimension_semantics<arbitrary>], iteration_bounds = array<i64: 2, 1, 1, 1>, scalar_prefetch = 0 : i64, scratch_operands = 1 : i64, tpu.core_type = #tpu.core_type<tc>, window_params = [{transform_indices = @transform_0, window_bounds = array<i64: 1, 256, 128>}, {transform_indices = @transform_1, window_bounds = array<i64: 128, 128>}, {transform_indices = @transform_2, window_bounds = array<i64: 1, 128>}, {transform_indices = @transform_3, window_bounds = array<i64: 1, 256, 128>}]} {
    %c0_i32 = arith.constant 0 : i32
    %0 = arith.cmpi eq, %arg3, %c0_i32 : i32
    %1 = arith.extui %0 : i1 to i32
    %c0_i32_0 = arith.constant 0 : i32
    %2 = arith.cmpi ne, %1, %c0_i32_0 : i32
    scf.if %2 {
      %c0_11 = arith.constant 0 : index
      %c0_12 = arith.constant 0 : index
      %13 = vector.load %arg6[%c0_11, %c0_12] : memref<1x128xf32, #tpu.memory_space<vmem>>, vector<1x128xf32>
      %14 = vector.shape_cast %13 : vector<1x128xf32> to vector<1x128xf32>
      %15 = vector.broadcast %14 : vector<1x128xf32> to vector<256x128xf32>
      %c0_13 = arith.constant 0 : index
      %c0_14 = arith.constant 0 : index
      %16 = vector.load %arg8[%c0_13, %c0_14] : memref<256x128xf32, #tpu.memory_space<vmem>>, vector<256x128xf32>
      tpu.vector_store %arg8[%c0_13, %c0_14], %15 {strides = array<i32>} : memref<256x128xf32, #tpu.memory_space<vmem>>, vector<256x128xf32>,
    } else {
    }
    %c0 = arith.constant 0 : index
    %c0_1 = arith.constant 0 : index
    %3 = vector.load %arg8[%c0, %c0_1] : memref<256x128xf32, #tpu.memory_space<vmem>>, vector<256x128xf32>
    %c0_2 = arith.constant 0 : index
    %c0_3 = arith.constant 0 : index
    %c0_4 = arith.constant 0 : index
    %4 = vector.load %arg4[%c0_2, %c0_3, %c0_4] : memref<1x256x128xbf16, #tpu.memory_space<vmem>>, vector<1x256x128xbf16>
    %5 = vector.shape_cast %4 : vector<1x256x128xbf16> to vector<256x128xbf16>
    %c0_5 = arith.constant 0 : index
    %c0_6 = arith.constant 0 : index
    %6 = vector.load %arg5[%c0_5, %c0_6] : memref<128x128xbf16, #tpu.memory_space<vmem>>, vector<128x128xbf16>
    %cst = arith.constant dense<0.000000e+00> : vector<256x128xf32>
    %7 = tpu.matmul %5, %6, %cst {dimension_numbers = #tpu.dot_dimension_numbers<[1], [0], [0], [1], [0, 0, 1, 1], [], []>} : vector<256x128xbf16>, vector<128x128xbf16>, vector<256x128xf32> -> vector<256x128xf32>
    %8 = arith.addf %3, %7 : vector<256x128xf32>
    %c0_7 = arith.constant 0 : index
    %c0_8 = arith.constant 0 : index
    %9 = vector.load %arg8[%c0_7, %c0_8] : memref<256x128xf32, #tpu.memory_space<vmem>>, vector<256x128xf32>
    tpu.vector_store %arg8[%c0_7, %c0_8], %8 {strides = array<i32>} : memref<256x128xf32, #tpu.memory_space<vmem>>, vector<256x128xf32>,
    %c0_i32_9 = arith.constant 0 : i32
    %10 = arith.cmpi eq, %arg3, %c0_i32_9 : i32
    %11 = arith.extui %10 : i1 to i32
    %c0_i32_10 = arith.constant 0 : i32
    %12 = arith.cmpi ne, %11, %c0_i32_10 : i32
    scf.if %12 {
      %c0_11 = arith.constant 0 : index
      %c0_12 = arith.constant 0 : index
      %13 = vector.load %arg8[%c0_11, %c0_12] : memref<256x128xf32, #tpu.memory_space<vmem>>, vector<256x128xf32>
      %cst_13 = arith.constant 0.000000e+00 : f32
      %14 = vector.broadcast %cst_13 : f32 to vector<256x128xf32>
      %15 = arith.maximumf %13, %14 : vector<256x128xf32>
      %16 = arith.truncf %15 : vector<256x128xf32> to vector<256x128xbf16>
      %c0_14 = arith.constant 0 : index
      %c0_15 = arith.constant 0 : index
      %c0_16 = arith.constant 0 : index
      %17 = vector.load %arg7[%c0_14, %c0_15, %c0_16] : memref<1x256x128xbf16, #tpu.memory_space<vmem>>, vector<1x256x128xbf16>
      %18 = vector.shape_cast %17 : vector<1x256x128xbf16> to vector<256x128xbf16>
      %19 = vector.shape_cast %16 : vector<256x128xbf16> to vector<1x256x128xbf16>
      tpu.vector_store %arg7[%c0_14, %c0_15, %c0_16], %19 {strides = array<i32>} : memref<1x256x128xbf16, #tpu.memory_space<vmem>>, vector<1x256x128xbf16>,
    } else {
    }
    return
  }
  func.func @transform_0(%arg0: i32, %arg1: i32, %arg2: i32, %arg3: i32) -> (i32, i32, i32) {
    %c0_i32 = arith.constant 0 : i32
    return %arg0, %arg1, %arg3 : i32, i32, i32
  }
  func.func @transform_1(%arg0: i32, %arg1: i32, %arg2: i32, %arg3: i32) -> (i32, i32) {
    %c0_i32 = arith.constant 0 : i32
    return %arg3, %arg2 : i32, i32
  }
  func.func @transform_2(%arg0: i32, %arg1: i32, %arg2: i32, %arg3: i32) -> (i32, i32) {
    %c0_i32 = arith.constant 0 : i32
    %c0_i32_0 = arith.constant 0 : i32
    return %c0_i32, %arg2 : i32, i32
  }
  func.func @transform_3(%arg0: i32, %arg1: i32, %arg2: i32, %arg3: i32) -> (i32, i32, i32) {
    %c0_i32 = arith.constant 0 : i32
    return %arg0, %arg1, %arg2 : i32, i32, i32
  }
}

</mosaic_0001>

<bundles_post_ra>
// kernel: tpu_custom_call.1
= control target key start
LH: loop header
LB: loop body
LE: loop exit
PB: predicated region body
PF: predicated region fallthrough
CT: control target
= control target key end

     0   :  { %8 = vsyncpa [#allocation4], 0  ;;  %s2074_s0 = inlined_call_operand.hbm [shape: bf16[2,256,128], index: 0, kind: input, shape index: {}]   ;;  %s2075_s1 = inlined_call_operand.hbm [shape: bf16[128,128], index: 1, kind: input, shape index: {}]   ;;  %s2076_s2 = inlined_call_operand.hbm [shape: f32[1,128], index: 2, kind: input, shape index: {}]   ;;  %s2077_s3 = inlined_call_operand.hbm [shape: bf16[2,256,128], index: 3, kind: output, shape index: {}]  }
   0x1   :  { %10 = vsyncpa [#allocation4 + $0x1], 0 }
   0x2   :  { %11 = vsyncpa [#allocation7], 0 }
   0x3   :  { %12 = vsyncpa [#allocation5], 0 }
   0x4   :  { %14 = vsyncpa [#allocation5 + $0x1], 0  ;;  %s1737_s12 = smov 0   ;;  %s1739_s13 = smov 0  }
   0x5   :  { %s1741_s14 = smov 0   ;;  %s1743_s15 = smov 0  }
   0x6   :  { %s1745_s16 = smov 0   ;;  %s1747_s17 = smov 0  }
   0x7 LB: > { %s1131_s18 = sadd.s32 4294967295, %s1707_s17   ;;  %s1132_s19 = sadd.s32 4294967294, %s1707_s17   ;;  %s1707_s17 = sphi %s1747_s17, %s20_s17   ;;  %s1703_s16 = sphi %s1745_s16, %s2099_s16   ;;  %s1699_s15 = sphi %s1743_s15, %s2098_s15   ;;  %s1695_s14 = sphi %s1741_s14, %s2097_s14   ;;  %s1691_s13 = sphi %s1739_s13, %s2096_s13   ;;  %s1687_s12 = sphi %s1737_s12, %s2095_s12  }
   0x8   : > { %p70_p0 = scmp.ne.s32.totalorder %s1691_s13, %s1687_s12  ;;  %p1771_p1 = scmp.eq.s32.totalorder %s1131_s18, 0 }
   0x9   : > { %p1775_p2 = scmp.eq.s32.totalorder %s1131_s18, 1  ;;  %p158_p3 = scmp.eq.s32.totalorder %s1132_s19, 1 }
   0xa   : > { %s2082_s20 = scalar_select %p1771_p1, 1, 0 }
   0xb   : > { %p1781_p4 = por %p1771_p1, %p70_p0  ;;  %p1133_p5 = scmp.ge.s32.totalorder %s1707_s17, 1 }
   0xc   : > { %p1786_p6 = por %p158_p3, %p70_p0  ;;  %p165_p7 = scmp.lt.s32.totalorder %s1707_s17, 3 }
   0xd   : > { %s2084_s22 = scalar_select %p1781_p4, 1, 0 }
   0xe   : > { %s2085_s23 = scalar_select %p1786_p6, 1, 0 }
   0xf   : > { %p1791_p8 = pnand %p1133_p5, %p165_p7  ;;  %s1709_s25 = smov [#allocation6]  }
  0x10   : > { %s181_s26 = sshll.u32 %s1709_s25, 4  ;;  %s1710_s28 = smov [#allocation8]   ;;  %s1795_s26 = int_to_ptr.vmem [resolvable:$true] %s181_s26 }
  0x11   : > { %p1436_p9 = pneg %p1791_p8  ;;  %s197_s29 = sshll.u32 %s1710_s28, 4  ;;  %s1806_s29 = int_to_ptr.vmem [resolvable:$true] %s197_s29 }
  0x12   : > { %s1535_s5 = scalar_lea.hbm %s2075_s1, 1024 }
  0x13   : > { %p1802_p11 = pnand %p1436_p9, %p1771_p1  ;;  %p1536_p12 = scmp.ne.s32.totalorder %s2075_s1, %s1535_s5 }
  0x14   : > { %p1542_p5 = scmp.lt.u32.totalorder %s1535_s5, %s2075_s1 }
  0x15   : > { %p1537_p13 = pneg %p1802_p11 }
  0x17   : > { %p1538_p0 = pnand %p1537_p13, %p1536_p12 }
  0x19   : > { %p1539_p3 = pneg %p1538_p0 }
  0x1b   : > { %p1544_p7 = pnand %p1542_p5, %p1539_p3 }
  0x1d   : > { %1547 = shalt.err (!%p1544_p7)
}
  0x1e   : > { %s1548_s10 = scalar_lea.vmem %s1795_s26, 1024  ;;  %p1556_p1 = scmp.lt.s32.totalorder %s1795_s26, %s1795_s26 }
  0x1f   : > { %p1549_p9 = scmp.ne.s32.totalorder %s1795_s26, %s1548_s10  ;;  %p1557_p12 = scmp.lt.s32.totalorder %s1548_s10, %s1548_s10 }
  0x21   : > { %p1551_p10 = pnand %p1549_p9, %p1537_p13  ;;  %p1558_p0 = por %p1557_p12, %p1556_p1 }
  0x23   : > { %p1552_p6 = pneg %p1551_p10 }
  0x25   : > { %p1559_p4 = pnand %p1558_p0, %p1552_p6 }
  0x27   : > { %1562 = shalt.err (!%p1559_p4)
}
  0x28   : > { %s1711_s11 = smov 64   ;;  %s1712_s18 = smov 4  }
  0x29   : > { %1439 = dma.hbm_to_vmem [thread:$0]  (!%p1802_p11), %s2075_s1, 1024, %s1795_s26, [#allocation7], %s1711_s11, %s1711_s11, %s1712_s18  }
  0x2a   : > { %s1563_s4 = scalar_lea.hbm %s2076_s2, 16 }
  0x2b   : > { %p1564_p1 = scmp.ne.s32.totalorder %s2076_s2, %s1563_s4  ;;  %p1570_p10 = scmp.lt.u32.totalorder %s1563_s4, %s2076_s2 }
  0x2d   : > { %p1566_p4 = pnand %p1564_p1, %p1537_p13 }
  0x2f   : > { %p1567_p6 = pneg %p1566_p4 }
  0x31   : > { %p1572_p3 = pnand %p1570_p10, %p1567_p6 }
  0x33   : > { %1575 = shalt.err (!%p1572_p3)
}
  0x34   : > { %s1576_s26 = scalar_lea.vmem %s1806_s29, 16  ;;  %s1583_s9 = scalar_lea.vmem %s1806_s29, 32 }
  0x35   : > { %p1577_p5 = scmp.ne.s32.totalorder %s1806_s29, %s1576_s26  ;;  %p1584_p12 = scmp.lt.s32.totalorder %s1806_s29, %s1806_s29 }
  0x36   : > { %p1585_p0 = scmp.lt.s32.totalorder %s1583_s9, %s1576_s26 }
  0x37   : > { %p1579_p7 = pnand %p1577_p5, %p1537_p13 }
  0x38   : > { %p1586_p1 = por %p1585_p0, %p1584_p12 }
  0x39   : > { %p1580_p9 = pneg %p1579_p7 }
  0x3b   : > { %p1587_p4 = pnand %p1586_p1, %p1580_p9 }
  0x3d   : > { %1590 = shalt.err (!%p1587_p4)
}
  0x3e   : > { %1442 = dma.hbm_to_vmem [thread:$0]  (!%p1802_p11), %s2076_s2, 16, %s1806_s29, [#allocation7]  }
  0x3f   : > { %s46_s25 = sadd.s32 1, %s1703_s16  ;;  %s57_s28 = sadd.s32 1, %s1695_s14 }
  0x40   : > { %p48_p13 = scmp.ge.s32.totalorder %s46_s25, 2  ;;  %p64_p6 = scmp.ne.s32.totalorder %s1695_s14, %s1691_s13 }
  0x41   : > { %p65_p10 = scmp.eq.s32.totalorder %s1707_s17, 0  ;;  %p1453_p3 = scmp.lt.s32.totalorder %s1707_s17, 2 }
  0x42   : > { %s2101_s25 = smov (%p48_p13, %s46_s25), 0  ;;  %p1874_p7 = por %p1775_p2, %p64_p6 }
  0x43   : > { %p66_p5 = por %p65_p10, %p64_p6  ;;  %s50_s30 = ssub.s32 %s1703_s16, %s2101_s25 }
  0x44   : > { %s2088_s27 = scalar_select %p1874_p7, 1, 0 }
  0x45   : > { %s208_s4 = sand.u32 1, %s1695_s14   ;;  %p55_p9 = scmp.eq.s32.totalorder %s50_s30, 0 }
  0x46   : > { %s1137_s29 = sshll.u32 %s208_s4, 7  ;;  %s1207_s5 = sshll.u32 %s1703_s16, 11 }
  0x47   : > { %s1883_s6 = scalar_select %p55_p9, %s1695_s14, %s57_s28  }
  0x48   : > { %s1888_s26 = scalar_lea.hbm %s2074_s0, %s1207_s5  ;;  %s212_s21 = scalar_lea.vmem [#allocation3], %s1137_s29 }
  0x49   : > { %s222_s9 = sshll.u32 %s212_s21, 4  ;;  %p1892_p2 = pnand %p1453_p3, %p66_p5  ;;  %s1896_s9 = int_to_ptr.vmem [resolvable:$true] %s222_s9 }
  0x4a   : > { %s1898_s19 = scalar_lea.sflag [#allocation4], %s208_s4  ;;  %s1591_s28 = scalar_lea.hbm %s1888_s26, 2048 }
  0x4b   : > { %p1592_p11 = scmp.ne.s32.totalorder %s1888_s26, %s1591_s28  ;;  %p1593_p12 = pneg %p1892_p2 }
  0x4c   : > { %s1596_s5 = scalar_lea.hbm %s2074_s0, 4096  ;;  %p1597_p4 = scmp.lt.u32.totalorder %s1888_s26, %s2074_s0 }
  0x4d   : > { %p1594_p0 = pnand %p1593_p12, %p1592_p11  ;;  %p1598_p13 = scmp.lt.u32.totalorder %s1596_s5, %s1591_s28 }
  0x4e   : > { %p1600_p10 = scmp.lt.u32.totalorder %s1591_s28, %s1888_s26 }
  0x4f   : > { %p1595_p1 = pneg %p1594_p0  ;;  %p1599_p6 = por %p1598_p13, %p1597_p4 }
  0x51   : > { %p1601_p3 = por %p1600_p10, %p1599_p6 }
  0x53   : > { %p1602_p5 = pnand %p1601_p3, %p1595_p1 }
  0x55   : > { %1605 = shalt.err (!%p1602_p5)
}
  0x56   : > { %s1606_s4 = scalar_lea.vmem %s1896_s9, 2048  ;;  %s1713_s21 = smov [#allocation3]  }
  0x57   : > { %p1607_p9 = scmp.ne.s32.totalorder %s1896_s9, %s1606_s4  ;;  %s1611_s30 = sshll.u32 %s1713_s21, 4  ;;  %s1612_s30 = int_to_ptr.vmem [resolvable:$false] %s1611_s30 }
  0x58   : > { %s1613_s29 = scalar_lea.vmem %s1612_s30, 4096  ;;  %p1614_p7 = scmp.lt.s32.totalorder %s1896_s9, %s1612_s30 }
  0x59   : > { %p1609_p11 = pnand %p1607_p9, %p1593_p12  ;;  %p1615_p4 = scmp.lt.s32.totalorder %s1613_s29, %s1606_s4 }
  0x5b   : > { %p1610_p0 = pneg %p1609_p11  ;;  %p1616_p13 = por %p1615_p4, %p1614_p7 }
  0x5d   : > { %p1617_p6 = pnand %p1616_p13, %p1610_p0 }
  0x5f   : > { %1620 = shalt.err (!%p1617_p6)
}
  0x60   : > { %1446 = dma.hbm_to_vmem [thread:$0]  (!%p1892_p2), %s1888_s26, 2048, %s1896_s9, %s1898_s19, %s1711_s11, %s1711_s11, %s1712_s18  }
  0x61   : > { %234 = sbr.rel (%p1791_p8) target bundleno = 401 (0x191), region = 32  ;;  %s1932_s28 = sand.u32 (!%p1791_p8), 1, %s1691_s13  }
  0x62   : > { %s1141_s5 = sshll.u32 (!%p1791_p8), %s1932_s28, 7  ;;  %s237_s7 = scalar_lea.sflag (!%p1791_p8), [#allocation4], %s1932_s28 }
  0x63   : > { %s1938_s10 = scalar_lea.vmem (!%p1791_p8), [#allocation3], %s1141_s5  ;;  %p2090_p7 = scmp.ne.s32.totalorder (!%p1791_p8), %s2084_s22, 0 }
  0x68   : > { %1674 = dma.done.wait (%p2090_p7), %s237_s7, 2048  }
  0x69   : > { %1676 = vsyncadd (%p2090_p7), %s237_s7, 4294965248  ;;  %p2091_p2 = scmp.ne.s32.totalorder %s2082_s20, 0 }
  0x6b   : > { %1678 = dma.done.wait (%p2091_p2), [#allocation7], 1040  }
  0x6c   : > { %1680 = vsyncadd (%p2091_p2), [#allocation7], 4294966256  ;;  %v1511_v0 = vld [vmem:[#allocation6] sm:$0xff]   ;;  %v1512_v1 = vld [vmem:[#allocation6 + $0x8] sm:$0xff]   ;;  %s1976_s20 = scalar_lea.vmem [#allocation9], %s1141_s5  ;;  %s1240_s22 = sshll.u32 %s1699_s15, 11 }
  0x6d   : > { %1360 = vmatprep.subr.bf16.mxu0 %v1511_v0  ;;  %1408 = vmatprep.subr.bf16.mxu1 %v1511_v0  ;;  %v1513_v2 = vld [vmem:[#allocation6 + $0x10] sm:$0xff]   ;;  %v1514_v3 = vld [vmem:[#allocation6 + $0x18] sm:$0xff]   ;;  %v1519_v4 = vld [vmem:[%s1938_s10] sm:$0xff]   ;;  %s1011_s24 = sshll.u32 %s1976_s20, 4  ;;  %s2019_s15 = scalar_lea.hbm %s2077_s3, %s1240_s22  ;;  %s2021_s24 = int_to_ptr.vmem [resolvable:$true] %s1011_s24 }
  0x6e   : > { %1361 = vmatpush3.bf16.msra.mxu0 %v1511_v0  ;;  %1416 = vmatpush3.bf16.msra.mxu1 %v1511_v0  ;;  %v1520_v5 = vld [vmem:[%s1938_s10 + $0x40] sm:$0xff]   ;;  %v1516_v7 = vld [vmem:[#allocation6 + $0x28] sm:$0xff]   ;;  %v1517_v8 = vld [vmem:[#allocation6 + $0x30] sm:$0xff]   ;;  %s995_s26 = scalar_lea.sflag [#allocation5], %s1932_s28  ;;  %s1621_s9 = scalar_lea.vmem %s2021_s24, 2048 }
  0x6f   : > { %1362 = vmatprep.subr.bf16.mxu0 %v1512_v1  ;;  %1409 = vmatprep.subr.bf16.mxu1 %v1512_v1  ;;  %v1515_v6 = vld [vmem:[#allocation6 + $0x20] sm:$0xff]   ;;  %v1518_v9 = vld [vmem:[#allocation6 + $0x38] sm:$0xff]   ;;  %v1521_v10 = vld [vmem:[%s1938_s10 + $0x8] sm:$0xff]   ;;  %p1622_p8 = scmp.ne.s32.totalorder %s2021_s24, %s1621_s9  ;;  %p2092_p12 = scmp.ne.s32.totalorder %s2088_s27, 0 }
  0x70   : > { %1376 = vmatprep.mubr.bf16.mxu0 %v1519_v4  ;;  %1392 = vmatprep.mubr.bf16.mxu1 %v1520_v5  ;;  %v1522_v11 = vld [vmem:[%s1938_s10 + $0x48] sm:$0xff]   ;;  %v1523_v12 = vld [vmem:[%s1938_s10 + $0x10] sm:$0xff]   ;;  %v1525_v14 = vld [vmem:[%s1938_s10 + $0x18] sm:$0xff]   ;;  %s1714_s19 = smov [#allocation9]  }
  0x71   : > { %v1524_v13 = vld [vmem:[%s1938_s10 + $0x50] sm:$0xff]   ;;  %v1526_v15 = vld [vmem:[%s1938_s10 + $0x58] sm:$0xff]   ;;  %v1527_v16 = vld [vmem:[%s1938_s10 + $0x20] sm:$0xff]   ;;  %p1623_p1 = pnand %p1622_p8, %p2092_p12  ;;  %s1625_s8 = sshll.u32 %s1714_s19, 4  ;;  %s1626_s8 = int_to_ptr.vmem [resolvable:$false] %s1625_s8 }
  0x72   : > { %1363 = vmatpush3.bf16.msra.mxu0 %v1512_v1  ;;  %1417 = vmatpush3.bf16.msra.mxu1 %v1512_v1  ;;  %v1528_v17 = vld [vmem:[%s1938_s10 + $0x60] sm:$0xff]   ;;  %v1529_v18 = vld [vmem:[%s1938_s10 + $0x28] sm:$0xff]   ;;  %v1531_v20 = vld [vmem:[%s1938_s10 + $0x30] sm:$0xff]   ;;  %s1627_s4 = scalar_lea.vmem %s1626_s8, 4096  ;;  %p1628_p3 = scmp.lt.s32.totalorder %s2021_s24, %s1626_s8 }
  0x73   : > { %1364 = vmatprep.subr.bf16.mxu0 %v1513_v2  ;;  %1410 = vmatprep.subr.bf16.mxu1 %v1513_v2  ;;  %v1530_v19 = vld [vmem:[%s1938_s10 + $0x68] sm:$0xff]   ;;  %v1532_v21 = vld [vmem:[%s1938_s10 + $0x70] sm:$0xff]   ;;  %v1533_v22 = vld [vmem:[%s1938_s10 + $0x38] sm:$0xff]   ;;  %p1624_p10 = pneg %p1623_p1  ;;  %p1629_p5 = scmp.lt.s32.totalorder %s1627_s4, %s1621_s9 }
  0x74   : > { %v1534_v23 = vld [vmem:[%s1938_s10 + $0x78] sm:$0xff]   ;;  %v1964_v24 = vld [vmem:[#allocation8] ss:$0 sm:$0xff] }
  0x75   : > { %p1630_p9 = por %p1629_p5, %p1628_p3 }
  0x76   : > { %1365 = vmatpush3.bf16.msra.mxu0 %v1513_v2  ;;  %1418 = vmatpush3.bf16.msra.mxu1 %v1513_v2 }
  0x77   : > { %1366 = vmatprep.subr.bf16.mxu0 %v1514_v3  ;;  %1411 = vmatprep.subr.bf16.mxu1 %v1514_v3  ;;  %p1631_p11 = pnand %p1630_p9, %p1624_p10 }
  0x7a   : > { %1367 = vmatpush3.bf16.msra.mxu0 %v1514_v3  ;;  %1419 = vmatpush3.bf16.msra.mxu1 %v1514_v3 }
  0x7b   : > { %1368 = vmatprep.subr.bf16.mxu0 %v1515_v6  ;;  %1412 = vmatprep.subr.bf16.mxu1 %v1515_v6 }
  0x7e   : > { %1369 = vmatpush3.bf16.msra.mxu0 %v1515_v6  ;;  %1420 = vmatpush3.bf16.msra.mxu1 %v1515_v6 }
  0x7f   : > { %1370 = vmatprep.subr.bf16.mxu0 %v1516_v7  ;;  %1413 = vmatprep.subr.bf16.mxu1 %v1516_v7 }
  0x82   : > { %1371 = vmatpush3.bf16.msra.mxu0 %v1516_v7  ;;  %1421 = vmatpush3.bf16.msra.mxu1 %v1516_v7 }
  0x83   : > { %1372 = vmatprep.subr.bf16.mxu0 %v1517_v8  ;;  %1414 = vmatprep.subr.bf16.mxu1 %v1517_v8 }
  0x86   : > { %1373 = vmatpush3.bf16.msra.mxu0 %v1517_v8  ;;  %1422 = vmatpush3.bf16.msra.mxu1 %v1517_v8 }
  0x87   : > { %1374 = vmatprep.subr.bf16.mxu0 %v1518_v9  ;;  %1415 = vmatprep.subr.bf16.mxu1 %v1518_v9 }
  0x8a   : > { %1375 = vmatpush3.bf16.msra.mxu0 %v1518_v9  ;;  %1423 = vmatpush3.bf16.msra.mxu1 %v1518_v9 }
  0x8d   : > { %1377 = vmatmul.mubr.bf16.vlgmr.msra.gmra.mrb[0].mxu0 %v1521_v10  ;;  %1393 = vmatmul.mubr.bf16.vlgmr.msra.gmra.mrb[0].mxu1 %v1522_v11 }
  0x8e   : > { %1380 = vmatprep.mubr.bf16.mxu0 %v1523_v12  ;;  %1396 = vmatprep.mubr.bf16.mxu1 %v1524_v13 }
  0x95   : > { %1381 = vmatmul.mubr.bf16.gmra.mrb[4].mxu0 %v1525_v14  ;;  %1397 = vmatmul.mubr.bf16.gmra.mrb[4].mxu1 %v1526_v15 }
  0x96   : > { %1384 = vmatprep.mubr.bf16.mxu0 %v1527_v16  ;;  %1400 = vmatprep.mubr.bf16.mxu1 %v1528_v17 }
  0x9d   : > { %1385 = vmatmul.mubr.bf16.gmra.mrb[8].mxu0 %v1529_v18  ;;  %1401 = vmatmul.mubr.bf16.gmra.mrb[8].mxu1 %v1530_v19 }
  0x9e   : > { %1388 = vmatprep.mubr.bf16.mxu0 %v1531_v20  ;;  %1404 = vmatprep.mubr.bf16.mxu1 %v1532_v21 }
  0xa5   : > { %1389 = vmatmul.mubr.bf16.gmra.mrb[12].mxu0 %v1533_v22  ;;  %1405 = vmatmul.mubr.bf16.gmra.mrb[12].mxu1 %v1534_v23 }
 0x160   : > { %v1378_v25 = vpop.f32.mrb[0].mxu0  ;;  %v1394_v26 = vpop.f32.mrb[0].mxu1 }
 0x161   : > { %v705_v27 = vadd.f32 %v1378_v25, %v1964_v24  ;;  %v721_v28 = vadd.f32 %v1394_v26, %v1964_v24  ;;  %v576_v29 = vpop.f32.mrb[1].mxu0  ;;  %v640_v30 = vpop.f32.mrb[1].mxu1 }
 0x162   : > { %v703_v31 = vadd.f32 %v1964_v24, %v576_v29  ;;  %v719_v32 = vadd.f32 %v1964_v24, %v640_v30  ;;  %v1379_v33 = vpop.f32.mrb[2].mxu0  ;;  %v1395_v34 = vpop.f32.mrb[2].mxu1 }
 0x163   : > { %v706_v35 = vadd.f32 %v1379_v33, %v1964_v24  ;;  %v722_v36 = vadd.f32 %v1395_v34, %v1964_v24  ;;  %v579_v37 = vpop.f32.mrb[3].mxu0  ;;  %v643_v38 = vpop.f32.mrb[3].mxu1  ;;  %v804_v41 = vmax.f32 %v705_v27, 0.0  ;;  %v820_v42 = vmax.f32 %v721_v28, 0.0 }
 0x164   : > { %v704_v39 = vadd.f32 %v1964_v24, %v579_v37  ;;  %v720_v40 = vadd.f32 %v1964_v24, %v643_v38  ;;  %v802_v45 = vmax.f32 %v703_v31, 0.0  ;;  %v818_v46 = vmax.f32 %v719_v32, 0.0 }
 0x165   : > { %v805_v43 = vmax.f32 %v706_v35, 0.0  ;;  %v821_v44 = vmax.f32 %v722_v36, 0.0 }
 0x166   : > { %v803_v47 = vmax.f32 %v704_v39, 0.0  ;;  %v819_v48 = vmax.f32 %v720_v40, 0.0 }
 0x167   : > { %v1249_v49 = vpack.c.bf16 %v805_v43, %v804_v41  ;;  %v1289_v50 = vpack.c.bf16 %v821_v44, %v820_v42 }
 0x168   : > { %v1244_v51 = vpack.c.bf16 %v803_v47, %v802_v45  ;;  %v1284_v52 = vpack.c.bf16 %v819_v48, %v818_v46  ;;  %v1382_v53 = vpop.f32.mrb[4].mxu0  ;;  %v1398_v54 = vpop.f32.mrb[4].mxu1 }
 0x169   : > { %1321 = vst [vmem:[%s1976_s20 + $0x8] sm:$0xff] %v1249_v49   ;;  %1329 = vst [vmem:[%s1976_s20 + $0x48] sm:$0xff] %v1289_v50   ;;  %v709_v55 = vadd.f32 %v1382_v53, %v1964_v24  ;;  %v725_v56 = vadd.f32 %v1398_v54, %v1964_v24  ;;  %v592_v57 = vpop.f32.mrb[5].mxu0  ;;  %v656_v58 = vpop.f32.mrb[5].mxu1 }
 0x16a   : > { %1245 = vst [vmem:[%s1976_s20] sm:$0xff] %v1244_v51   ;;  %1328 = vst [vmem:[%s1976_s20 + $0x40] sm:$0xff] %v1284_v52   ;;  %v707_v59 = vadd.f32 %v1964_v24, %v592_v57  ;;  %v723_v60 = vadd.f32 %v1964_v24, %v656_v58  ;;  %v1383_v61 = vpop.f32.mrb[6].mxu0  ;;  %v1399_v62 = vpop.f32.mrb[6].mxu1 }
 0x16b   : > { %v710_v63 = vadd.f32 %v1383_v61, %v1964_v24  ;;  %v726_v0 = vadd.f32 %v1399_v62, %v1964_v24  ;;  %v595_v1 = vpop.f32.mrb[7].mxu0  ;;  %v659_v2 = vpop.f32.mrb[7].mxu1  ;;  %v808_v5 = vmax.f32 %v709_v55, 0.0  ;;  %v824_v6 = vmax.f32 %v725_v56, 0.0 }
 0x16c   : > { %v708_v3 = vadd.f32 %v1964_v24, %v595_v1  ;;  %v724_v4 = vadd.f32 %v1964_v24, %v659_v2  ;;  %v806_v9 = vmax.f32 %v707_v59, 0.0  ;;  %v822_v10 = vmax.f32 %v723_v60, 0.0 }
 0x16d   : > { %v809_v7 = vmax.f32 %v710_v63, 0.0  ;;  %v825_v8 = vmax.f32 %v726_v0, 0.0 }
 0x16e   : > { %v807_v11 = vmax.f32 %v708_v3, 0.0  ;;  %v823_v12 = vmax.f32 %v724_v4, 0.0 }
 0x16f   : > { %v1259_v13 = vpack.c.bf16 %v809_v7, %v808_v5  ;;  %v1299_v14 = vpack.c.bf16 %v825_v8, %v824_v6 }
 0x170   : > { %v1254_v15 = vpack.c.bf16 %v807_v11, %v806_v9  ;;  %v1294_v16 = vpack.c.bf16 %v823_v12, %v822_v10  ;;  %v1386_v17 = vpop.f32.mrb[8].mxu0  ;;  %v1402_v18 = vpop.f32.mrb[8].mxu1 }
 0x171   : > { %1323 = vst [vmem:[%s1976_s20 + $0x18] sm:$0xff] %v1259_v13   ;;  %1331 = vst [vmem:[%s1976_s20 + $0x58] sm:$0xff] %v1299_v14   ;;  %v713_v19 = vadd.f32 %v1386_v17, %v1964_v24  ;;  %v729_v20 = vadd.f32 %v1402_v18, %v1964_v24  ;;  %v608_v21 = vpop.f32.mrb[9].mxu0  ;;  %v672_v22 = vpop.f32.mrb[9].mxu1 }
 0x172   : > { %1322 = vst [vmem:[%s1976_s20 + $0x10] sm:$0xff] %v1254_v15   ;;  %1330 = vst [vmem:[%s1976_s20 + $0x50] sm:$0xff] %v1294_v16   ;;  %v711_v23 = vadd.f32 %v1964_v24, %v608_v21  ;;  %v727_v25 = vadd.f32 %v1964_v24, %v672_v22  ;;  %v1387_v26 = vpop.f32.mrb[10].mxu0  ;;  %v1403_v27 = vpop.f32.mrb[10].mxu1 }
 0x173   : > { %v714_v28 = vadd.f32 %v1387_v26, %v1964_v24  ;;  %v730_v29 = vadd.f32 %v1403_v27, %v1964_v24  ;;  %v611_v30 = vpop.f32.mrb[11].mxu0  ;;  %v675_v31 = vpop.f32.mrb[11].mxu1  ;;  %v812_v34 = vmax.f32 %v713_v19, 0.0  ;;  %v828_v35 = vmax.f32 %v729_v20, 0.0 }
 0x174   : > { %v712_v32 = vadd.f32 %v1964_v24, %v611_v30  ;;  %v728_v33 = vadd.f32 %v1964_v24, %v675_v31  ;;  %v810_v38 = vmax.f32 %v711_v23, 0.0  ;;  %v826_v39 = vmax.f32 %v727_v25, 0.0 }
 0x175   : > { %v813_v36 = vmax.f32 %v714_v28, 0.0  ;;  %v829_v37 = vmax.f32 %v730_v29, 0.0 }
 0x176   : > { %v811_v40 = vmax.f32 %v712_v32, 0.0  ;;  %v827_v41 = vmax.f32 %v728_v33, 0.0 }
 0x177   : > { %v1269_v42 = vpack.c.bf16 %v813_v36, %v812_v34  ;;  %v1309_v43 = vpack.c.bf16 %v829_v37, %v828_v35 }
 0x178   : > { %v1264_v44 = vpack.c.bf16 %v811_v40, %v810_v38  ;;  %v1304_v45 = vpack.c.bf16 %v827_v41, %v826_v39  ;;  %v1390_v46 = vpop.f32.mrb[12].mxu0  ;;  %v1406_v47 = vpop.f32.mrb[12].mxu1 }
 0x179   : > { %1325 = vst [vmem:[%s1976_s20 + $0x28] sm:$0xff] %v1269_v42   ;;  %1333 = vst [vmem:[%s1976_s20 + $0x68] sm:$0xff] %v1309_v43   ;;  %v717_v48 = vadd.f32 %v1390_v46, %v1964_v24  ;;  %v733_v49 = vadd.f32 %v1406_v47, %v1964_v24  ;;  %v624_v50 = vpop.f32.mrb[13].mxu0  ;;  %v688_v51 = vpop.f32.mrb[13].mxu1 }
 0x17a   : > { %1324 = vst [vmem:[%s1976_s20 + $0x20] sm:$0xff] %v1264_v44   ;;  %1332 = vst [vmem:[%s1976_s20 + $0x60] sm:$0xff] %v1304_v45   ;;  %v715_v52 = vadd.f32 %v1964_v24, %v624_v50  ;;  %v731_v53 = vadd.f32 %v1964_v24, %v688_v51  ;;  %v1391_v54 = vpop.f32.mrb[14].mxu0  ;;  %v1407_v55 = vpop.f32.mrb[14].mxu1 }
 0x17b   : > { %v718_v56 = vadd.f32 %v1391_v54, %v1964_v24  ;;  %v734_v57 = vadd.f32 %v1407_v55, %v1964_v24  ;;  %v627_v58 = vpop.f32.mrb[15].mxu0  ;;  %v691_v59 = vpop.f32.mrb[15].mxu1  ;;  %v816_v62 = vmax.f32 %v717_v48, 0.0  ;;  %v832_v63 = vmax.f32 %v733_v49, 0.0 }
 0x17c   : > { %v716_v60 = vadd.f32 %v1964_v24, %v627_v58  ;;  %v732_v61 = vadd.f32 %v1964_v24, %v691_v59  ;;  %v814_v2 = vmax.f32 %v715_v52, 0.0  ;;  %v830_v3 = vmax.f32 %v731_v53, 0.0 }
 0x17d   : > { %v817_v0 = vmax.f32 %v718_v56, 0.0  ;;  %v833_v1 = vmax.f32 %v734_v57, 0.0 }
 0x17e   : > { %v815_v4 = vmax.f32 %v716_v60, 0.0  ;;  %v831_v5 = vmax.f32 %v732_v61, 0.0 }
 0x17f   : > { %v1279_v6 = vpack.c.bf16 %v817_v0, %v816_v62  ;;  %v1319_v7 = vpack.c.bf16 %v833_v1, %v832_v63 }
 0x180   : > { %v1274_v24 = vpack.c.bf16 %v815_v4, %v814_v2  ;;  %v1314_v8 = vpack.c.bf16 %v831_v5, %v830_v3 }
 0x181   : > { %1327 = vst [vmem:[%s1976_s20 + $0x38] sm:$0xff] %v1279_v6   ;;  %1335 = vst [vmem:[%s1976_s20 + $0x78] sm:$0xff] %v1319_v7  }
 0x182   : > { %1326 = vst [vmem:[%s1976_s20 + $0x30] sm:$0xff] %v1274_v24   ;;  %1334 = vst [vmem:[%s1976_s20 + $0x70] sm:$0xff] %v1314_v8  }
 0x183   : > { %1634 = shalt.err (!%p1631_p11)
}
 0x184   : > { %s1635_s21 = scalar_lea.hbm %s2019_s15, 2048  ;;  %s1639_s5 = scalar_lea.hbm %s2077_s3, 4096 }
 0x185   : > { %p1636_p0 = scmp.ne.s32.totalorder %s2019_s15, %s1635_s21  ;;  %p1640_p6 = scmp.lt.u32.totalorder %s2019_s15, %s2077_s3 }
 0x186   : > { %p1641_p7 = scmp.lt.u32.totalorder %s1639_s5, %s1635_s21  ;;  %p1643_p8 = scmp.lt.u32.totalorder %s1635_s21, %s2019_s15 }
 0x187   : > { %p1637_p4 = pnand %p1636_p0, %p2092_p12 }
 0x188   : > { %p1642_p2 = por %p1641_p7, %p1640_p6 }
 0x189   : > { %p1638_p13 = pneg %p1637_p4 }
 0x18a   : > { %p1644_p1 = por %p1643_p8, %p1642_p2 }
 0x18c   : > { %p1645_p10 = pnand %p1644_p1, %p1638_p13 }
 0x18e   : > { %1648 = shalt.err (!%p1645_p10)
}
 0x18f   : > { %s1715_s20 = smov 64   ;;  %s1716_s22 = smov 4  }
 0x190   : > { %1434 = dma.vmem_to_hbm [thread:$0]  (%p2092_p12), %s2021_s24, 2048, %s2019_s15, %s995_s26, %s1715_s20, %s1715_s20, %s1716_s22  }
 0x191 PF: > { %s1026_s11 = sand.u32 1, %s1687_s12   ;;  %p2093_p3 = scmp.ne.s32.totalorder %s2085_s23, 0 }
 0x192   : > { %p2094_p5 = scmp.ge.s32.totalorder %s1707_s17, 2  ;;  %s1027_s18 = scalar_lea.sflag [#allocation5], %s1026_s11 }
 0x194   : > { %p1448_p9 = pnand %p2094_p5, %p2093_p3 }
 0x196   : > { %1682 = dma.done.wait (!%p1448_p9), %s1027_s18, 2048  }
 0x197   : > { %1684 = vsyncadd (!%p1448_p9), %s1027_s18, 4294965248  ;;  %s20_s17 = sadd.s32 1, %s1707_s17   ;;  %s2095_s12 = smov %s1691_s13 }
 0x198   : > { %p17_p11 = scmp.ge.s32.totalorder %s20_s17, 4   ;;  %s2096_s13 = smov %s1695_s14 }
 0x199   : > { %s2097_s14 = smov %s1883_s6  ;;  %s2098_s15 = smov %s1703_s16 }
 0x19a   : > { %s2099_s16 = smov %s2101_s25  ;;  %19 = sbr.rel (!%p17_p11) target bundleno = 7 (0x7), region = 95 }
 0x1a1   :  { %1032 = vsyncpa [#allocation4], 1 }
 0x1a2   :  { %1034 = vsyncpa [#allocation4 + $0x1], 1 }
 0x1a3   :  { %1035 = vsyncpa [#allocation7], 1 }
 0x1a4   :  { %1036 = vsyncpa [#allocation5], 1 }
 0x1a5   :  { %1038 = vsyncpa [#allocation5 + $0x1], 1 }

</bundles_post_ra>
